<compile_context>
chip_gen: v5e
topology: v5e:2x2
jax: 0.10.0
libtpu: 0.0.40
codegen_flags: <defaults>
</compile_context>

<pallas_src>
import functools

import jax
import jax.numpy as jnp
from jax.experimental import pallas as pl
from jax.experimental.pallas import tpu as pltpu

NUM_RESIDUE_TYPES = 21        # len(data.Protein.residue2id) in torchdrug
MAX_SEQ_DIST = 10             # CG22_GraphConstruction.max_seq_dist
MAX_EDGE_TILE = 8192          # edges per grid step (sweepable: 4096..16384)


# ----------------------------- Pallas kernels ------------------------------ #

def _edge_gearnet_kernel(num_relation, packed_ref, out_ref):
    """Fused gearnet edge features.

    packed_ref: (tile, 11) int32 —
        [in_res, out_res, rel, residue_in, residue_out,
         bits(pos_in.x/y/z), bits(pos_out.x/y/z)]
    out_ref: (tile, feat_dim) f32, feat_dim = 42 + num_relation + 11 + 1.
    """
    te, feat_dim = out_ref.shape

    raw = packed_ref[...]
    in_res = raw[:, 0:1]
    out_res = raw[:, 1:2]
    rel = raw[:, 2:3]
    res_in = raw[:, 3:4]
    res_out = raw[:, 4:5]
    seq = jnp.minimum(jnp.abs(res_in - res_out), MAX_SEQ_DIST)

    # positions travel as raw int32 bit patterns in lanes 5..10
    pos = pltpu.bitcast(raw[:, 5:11], jnp.float32)            # (te, 6)
    d = pos[:, 0:3] - pos[:, 3:6]                             # (te, 3) one-slab delta
    d2 = d * d
    d2s = d2[:, 0:1] + d2[:, 1:2] + d2[:, 2:3]                # (te, 1)
    spatial = jnp.sqrt(d2s)                                   # narrow column -> EUP

    off_out = NUM_RESIDUE_TYPES
    off_rel = 2 * NUM_RESIDUE_TYPES
    off_seq = off_rel + num_relation

    # NOTE: assumes in-range attribute values (as torch one_hot requires);
    # out-of-range values would alias into the next one-hot block.
    iota = jax.lax.broadcasted_iota(jnp.int32, (te, feat_dim), 1)
    hit = ((iota == in_res)
           | (iota == out_res + off_out)
           | (iota == rel + off_rel)
           | (iota == seq + off_seq))
    out_ref[...] = hit.astype(jnp.float32)
    out_ref[:, feat_dim - 1:feat_dim] = spatial               # narrow column store


def _edge_residue_type_kernel(idx_ref, out_ref):
    """idx_ref: (tile, 2) int32 — [in_res, out_res]; out_ref: (tile, 42) f32."""
    te, feat_dim = out_ref.shape
    idx = idx_ref[...]
    in_res = idx[:, 0:1]
    out_res = idx[:, 1:2]
    iota = jax.lax.broadcasted_iota(jnp.int32, (te, feat_dim), 1)
    hit = (iota == in_res) | (iota == out_res + NUM_RESIDUE_TYPES)
    out_ref[...] = hit.astype(jnp.float32)


# ------------------------------ kernel wrappers ----------------------------- #

def _round_up(x, m):
    return (x + m - 1) // m * m


def _pick_tile(e):
    # >= 2 grid steps whenever possible so the "parallel" axis feeds both v7x
    # TensorCores; rows a multiple of 8 (sublane), capped for VMEM headroom.
    tile = _round_up(max(pl.cdiv(max(e, 1), 2), 1), 8)
    return min(MAX_EDGE_TILE, tile)


def edge_gearnet_pallas(packed, num_relation):
    """packed (E, 11) int32 -> (E, 42 + R + 11 + 1) f32."""
    e = packed.shape[0]
    feat_dim = 2 * NUM_RESIDUE_TYPES + num_relation + (MAX_SEQ_DIST + 1) + 1
    tile = _pick_tile(e)
    grid = (pl.cdiv(e, tile),)

    return pl.pallas_call(
        functools.partial(_edge_gearnet_kernel, num_relation),
        out_shape=jax.ShapeDtypeStruct((e, feat_dim), jnp.float32),
        grid=grid,
        in_specs=[pl.BlockSpec((tile, 11), lambda i: (i, 0))],
        out_specs=pl.BlockSpec((tile, feat_dim), lambda i: (i, 0)),
        compiler_params=pltpu.CompilerParams(dimension_semantics=("parallel",)),
    )(packed)


def edge_residue_type_pallas(idx_packed):
    """idx_packed (E, 2) int32 -> (E, 42) f32."""
    e = idx_packed.shape[0]
    feat_dim = 2 * NUM_RESIDUE_TYPES
    tile = _pick_tile(e)
    grid = (pl.cdiv(e, tile),)

    return pl.pallas_call(
        _edge_residue_type_kernel,
        out_shape=jax.ShapeDtypeStruct((e, feat_dim), jnp.float32),
        grid=grid,
        in_specs=[pl.BlockSpec((tile, 2), lambda i: (i, 0))],
        out_specs=pl.BlockSpec((tile, feat_dim), lambda i: (i, 0)),
        compiler_params=pltpu.CompilerParams(dimension_semantics=("parallel",)),
    )(idx_packed)


# --------------------------- module-level wrapper --------------------------- #

class CG22GraphConstruction:
    """JAX re-implementation of CG22_GraphConstruction.forward.

    Graphs are plain dicts of arrays (the module has no learnable parameters).
    """
    max_seq_dist = MAX_SEQ_DIST

    def __init__(self, node_layers=None, edge_layers=None, edge_feature="residue_type"):
        self.node_layers = list(node_layers) if node_layers else []
        self.edge_layers = list(edge_layers) if edge_layers else []
        self.edge_feature = edge_feature

    # ---- edge feature functions (hot path in Pallas) ----
    def edge_residue_type(self, graph, edge_list, num_relation):
        node_in, node_out = edge_list[:, 0], edge_list[:, 1]
        residue_in = graph["atom2residue"][node_in]
        residue_out = graph["atom2residue"][node_out]
        in_res = graph["residue_type"][residue_in].astype(jnp.int32)
        out_res = graph["residue_type"][residue_out].astype(jnp.int32)
        idx_packed = jnp.stack([in_res, out_res], axis=1)            # (E, 2) int32
        return edge_residue_type_pallas(idx_packed)

    def edge_gearnet(self, graph, edge_list, num_relation):
        # TODO(synk): fold the small-table lookups (residue_type, bead2residue)
        # and the packing concat into the kernel (scalar-prefetch / in-kernel
        # gather) to eliminate the (E, 11) intermediate HBM round-trip.
        node_in, node_out, r = edge_list[:, 0], edge_list[:, 1], edge_list[:, 2]
        residue_in = graph["bead2residue"][node_in].astype(jnp.int32)
        residue_out = graph["bead2residue"][node_out].astype(jnp.int32)
        in_res = graph["residue_type"][residue_in].astype(jnp.int32)
        out_res = graph["residue_type"][residue_out].astype(jnp.int32)
        pos_in = graph["node_position"][node_in].astype(jnp.float32)
        pos_out = graph["node_position"][node_out].astype(jnp.float32)

        ints = jnp.stack([in_res, out_res, r.astype(jnp.int32),
                          residue_in, residue_out], axis=1)          # (E, 5) int32
        pos_bits = jax.lax.bitcast_convert_type(
            jnp.concatenate([pos_in, pos_out], axis=1), jnp.int32)   # (E, 6) int32
        packed = jnp.concatenate([ints, pos_bits], axis=1)           # (E, 11) int32
        # num_relation must be a static Python int (it defines the feature width).
        return edge_gearnet_pallas(packed, int(num_relation))

    # ---- graph plumbing (glue, plain JAX) ----
    def apply_node_layer(self, graph):
        for layer in self.node_layers:
            graph = layer(graph)
        return graph

    def apply_edge_layer(self, graph):
        if not self.edge_layers:
            return graph
        edge_list, num_relation = self.edge_layers[0](graph)
        node_in = edge_list[:, 0]
        edge2graph = graph["node2graph"][node_in]
        order = jnp.argsort(edge2graph, stable=True)
        edge_list = edge_list[order]
        num_edges = jnp.bincount(edge2graph, length=graph["batch_size"])
        offsets = jnp.repeat(graph["num_cum_nodes"] - graph["num_nodes"], num_edges,
                             total_repeat_length=edge_list.shape[0])

        if self.edge_feature == "gearnet":
            edge_feature = self.edge_gearnet(graph, edge_list, num_relation)
        elif self.edge_feature == "residue_type":
            edge_feature = self.edge_residue_type(graph, edge_list, num_relation)
        elif self.edge_feature is None:
            edge_feature = None
        else:
            raise ValueError("Unknown edge feature `%s`" % self.edge_feature)

        # TODO(synk): torchdrug's PackedProtein re-packing (data_by_meta,
        # meta_dict) is pure Python bookkeeping with no Pallas equivalent;
        # the new graph is returned as a dict instead.
        new_graph = dict(graph)
        new_graph.update(edge_list=edge_list, num_edges=num_edges,
                         num_relation=num_relation, offsets=offsets,
                         edge_feature=edge_feature)
        return new_graph

    def __call__(self, graph):
        graph = self.apply_node_layer(graph)
        graph = self.apply_edge_layer(graph)
        return graph


class SyntheticEdgeLayer:
    """Stands in for torchdrug geometry edge layers: returns (edge_list, num_relation)."""

    def __init__(self, edge_list, num_relation):
        self.edge_list = edge_list
        self.num_relation = num_relation

    def __call__(self, graph):
        return self.edge_list, self.num_relation


# --------------------------------- reference -------------------------------- #

def _ref_gearnet(graph, edge_list, num_relation):
    node_in, node_out, r = edge_list[:, 0], edge_list[:, 1], edge_list[:, 2]
    residue_in = graph["bead2residue"][node_in]
    residue_out = graph["bead2residue"][node_out]
    in_res = graph["residue_type"][residue_in]
    out_res = graph["residue_type"][residue_out]
    seq_dist = jnp.clip(jnp.abs(residue_in - residue_out), max=MAX_SEQ_DIST)
    spatial = jnp.linalg.norm(
        graph["node_position"][node_in] - graph["node_position"][node_out], axis=-1)
    return jnp.concatenate([
        jax.nn.one_hot(in_res, NUM_RESIDUE_TYPES, dtype=jnp.float32),
        jax.nn.one_hot(out_res, NUM_RESIDUE_TYPES, dtype=jnp.float32),
        jax.nn.one_hot(r, num_relation, dtype=jnp.float32),
        jax.nn.one_hot(seq_dist, MAX_SEQ_DIST + 1, dtype=jnp.float32),
        spatial[:, None],
    ], axis=-1)


def _ref_residue_type(graph, edge_list):
    node_in, node_out = edge_list[:, 0], edge_list[:, 1]
    in_res = graph["residue_type"][graph["atom2residue"][node_in]]
    out_res = graph["residue_type"][graph["atom2residue"][node_out]]
    return jnp.concatenate([
        jax.nn.one_hot(in_res, NUM_RESIDUE_TYPES, dtype=jnp.float32),
        jax.nn.one_hot(out_res, NUM_RESIDUE_TYPES, dtype=jnp.float32),
    ], axis=-1)


# ----------------------------------- main ----------------------------------- #

if __name__ == "__main__":
    key = jax.random.PRNGKey(0)
    k1, k2, k3, k4, k5, k6 = jax.random.split(key, 6)

    batch_size = 2
    num_nodes_per_graph = 16
    n_nodes = batch_size * num_nodes_per_graph          # 32 beads
    n_residues = 16
    n_edges = 200                                       # non-divisible -> partial last tile
    num_relation = 7

    node_position = jax.random.normal(k1, (n_nodes, 3), jnp.float32) * 3.0
    bead2residue = jax.random.randint(k2, (n_nodes,), 0, n_residues, jnp.int32)
    residue_type = jax.random.randint(k3, (n_residues,), 0, NUM_RESIDUE_TYPES, jnp.int32)
    node2graph = jnp.repeat(jnp.arange(batch_size, dtype=jnp.int32), num_nodes_per_graph)
    num_nodes = jnp.full((batch_size,), num_nodes_per_graph, jnp.int32)
    num_cum_nodes = jnp.cumsum(num_nodes)

    edge_src = jax.random.randint(k4, (n_edges,), 0, n_nodes, jnp.int32)
    edge_dst = jax.random.randint(k5, (n_edges,), 0, n_nodes, jnp.int32)
    edge_rel = jax.random.randint(k6, (n_edges,), 0, num_relation, jnp.int32)
    edge_list = jnp.stack([edge_src, edge_dst, edge_rel], axis=1)

    graph = dict(
        batch_size=batch_size,
        node_position=node_position,
        bead2residue=bead2residue,
        atom2residue=bead2residue,
        residue_type=residue_type,
        node2graph=node2graph,
        num_nodes=num_nodes,
        num_cum_nodes=num_cum_nodes,
    )

    module = CG22GraphConstruction(
        node_layers=None,
        edge_layers=[SyntheticEdgeLayer(edge_list, num_relation)],
        edge_feature="gearnet",
    )

    new_graph = module(graph)
    feat = jax.block_until_ready(new_graph["edge_feature"])

    expected_dim = 2 * NUM_RESIDUE_TYPES + num_relation + (MAX_SEQ_DIST + 1) + 1
    assert feat.shape == (n_edges, expected_dim), feat.shape

    # correctness vs pure-JAX reference on the (already reordered) edge list
    ref = _ref_gearnet(graph, new_graph["edge_list"], num_relation)
    assert jnp.allclose(feat, ref, atol=1e-5), float(jnp.max(jnp.abs(feat - ref)))

    # also exercise the residue_type feature kernel (default edge_feature)
    module_rt = CG22GraphConstruction(
        edge_layers=[SyntheticEdgeLayer(edge_list, num_relation)],
        edge_feature="residue_type",
    )
    new_graph_rt = module_rt(graph)
    feat_rt = jax.block_until_ready(new_graph_rt["edge_feature"])
    assert feat_rt.shape == (n_edges, 2 * NUM_RESIDUE_TYPES)
    ref_rt = _ref_residue_type(graph, new_graph_rt["edge_list"])
    assert jnp.allclose(feat_rt, ref_rt, atol=1e-5)

    print("KERNEL_OK")
</pallas_src>

<mosaic_0001>
module attributes {stable_mosaic.version = 11 : i64} {
  func.func @_edge_gearnet_kernel(%arg0: i32, %arg1: memref<104x11xi32, #tpu.memory_space<vmem>>, %arg2: memref<104x61xf32, #tpu.memory_space<vmem>>) attributes {dimension_semantics = [#tpu.dimension_semantics<parallel>], iteration_bounds = array<i64: 2>, scalar_prefetch = 0 : i64, scratch_operands = 0 : i64, tpu.core_type = #tpu.core_type<tc>, window_params = [{transform_indices = @transform_0, window_bounds = array<i64: 104, 11>}, {transform_indices = @transform_1, window_bounds = array<i64: 104, 61>}]} {
    %c0 = arith.constant 0 : index
    %c0_0 = arith.constant 0 : index
    %0 = vector.load %arg1[%c0, %c0_0] : memref<104x11xi32, #tpu.memory_space<vmem>>, vector<104x11xi32>
    %1 = vector.extract_strided_slice %0 {offsets = [0, 0], sizes = [104, 1], strides = [1, 1]} : vector<104x11xi32> to vector<104x1xi32>
    %2 = vector.extract_strided_slice %0 {offsets = [0, 1], sizes = [104, 1], strides = [1, 1]} : vector<104x11xi32> to vector<104x1xi32>
    %3 = vector.extract_strided_slice %0 {offsets = [0, 2], sizes = [104, 1], strides = [1, 1]} : vector<104x11xi32> to vector<104x1xi32>
    %4 = vector.extract_strided_slice %0 {offsets = [0, 3], sizes = [104, 1], strides = [1, 1]} : vector<104x11xi32> to vector<104x1xi32>
    %5 = vector.extract_strided_slice %0 {offsets = [0, 4], sizes = [104, 1], strides = [1, 1]} : vector<104x11xi32> to vector<104x1xi32>
    %6 = arith.subi %4, %5 : vector<104x1xi32>
    %7 = math.absi %6 : vector<104x1xi32>
    %c10_i32 = arith.constant 10 : i32
    %8 = vector.broadcast %c10_i32 : i32 to vector<104x1xi32>
    %9 = arith.minsi %7, %8 : vector<104x1xi32>
    %10 = vector.extract_strided_slice %0 {offsets = [0, 5], sizes = [104, 6], strides = [1, 1]} : vector<104x11xi32> to vector<104x6xi32>
    %11 = tpu.bitcast %10 : vector<104x6xi32> -> vector<104x6xf32>
    %12 = vector.extract_strided_slice %11 {offsets = [0, 0], sizes = [104, 3], strides = [1, 1]} : vector<104x6xf32> to vector<104x3xf32>
    %13 = vector.extract_strided_slice %11 {offsets = [0, 3], sizes = [104, 3], strides = [1, 1]} : vector<104x6xf32> to vector<104x3xf32>
    %14 = arith.subf %12, %13 : vector<104x3xf32>
    %15 = arith.mulf %14, %14 : vector<104x3xf32>
    %16 = vector.extract_strided_slice %15 {offsets = [0, 0], sizes = [104, 1], strides = [1, 1]} : vector<104x3xf32> to vector<104x1xf32>
    %17 = vector.extract_strided_slice %15 {offsets = [0, 1], sizes = [104, 1], strides = [1, 1]} : vector<104x3xf32> to vector<104x1xf32>
    %18 = arith.addf %16, %17 : vector<104x1xf32>
    %19 = vector.extract_strided_slice %15 {offsets = [0, 2], sizes = [104, 1], strides = [1, 1]} : vector<104x3xf32> to vector<104x1xf32>
    %20 = arith.addf %18, %19 : vector<104x1xf32>
    %21 = math.sqrt %20 : vector<104x1xf32>
    %22 = tpu.iota {dimensions = array<i32: 1>} : vector<104x61xi32>
    %23 = vector.broadcast %1 : vector<104x1xi32> to vector<104x61xi32>
    %24 = arith.cmpi eq, %22, %23 : vector<104x61xi32>
    %c21_i32 = arith.constant 21 : i32
    %25 = vector.broadcast %c21_i32 : i32 to vector<104x1xi32>
    %26 = arith.addi %2, %25 : vector<104x1xi32>
    %27 = vector.broadcast %26 : vector<104x1xi32> to vector<104x61xi32>
    %28 = arith.cmpi eq, %22, %27 : vector<104x61xi32>
    %29 = arith.ori %24, %28 : vector<104x61xi1>
    %c42_i32 = arith.constant 42 : i32
    %30 = vector.broadcast %c42_i32 : i32 to vector<104x1xi32>
    %31 = arith.addi %3, %30 : vector<104x1xi32>
    %32 = vector.broadcast %31 : vector<104x1xi32> to vector<104x61xi32>
    %33 = arith.cmpi eq, %22, %32 : vector<104x61xi32>
    %34 = arith.ori %29, %33 : vector<104x61xi1>
    %c49_i32 = arith.constant 49 : i32
    %35 = vector.broadcast %c49_i32 : i32 to vector<104x1xi32>
    %36 = arith.addi %9, %35 : vector<104x1xi32>
    %37 = vector.broadcast %36 : vector<104x1xi32> to vector<104x61xi32>
    %38 = arith.cmpi eq, %22, %37 : vector<104x61xi32>
    %39 = arith.ori %34, %38 : vector<104x61xi1>
    %40 = arith.extui %39 : vector<104x61xi1> to vector<104x61xi32>
    %41 = arith.sitofp %40 : vector<104x61xi32> to vector<104x61xf32>
    %c0_1 = arith.constant 0 : index
    %c0_2 = arith.constant 0 : index
    %42 = vector.load %arg2[%c0_1, %c0_2] : memref<104x61xf32, #tpu.memory_space<vmem>>, vector<104x61xf32>
    tpu.vector_store %arg2[%c0_1, %c0_2], %41 {strides = array<i32>} : memref<104x61xf32, #tpu.memory_space<vmem>>, vector<104x61xf32>,
    %c0_3 = arith.constant 0 : index
    %c60 = arith.constant 60 : index
    %43 = vector.load %arg2[%c0_3, %c60] : memref<104x61xf32, #tpu.memory_space<vmem>>, vector<104x1xf32>
    tpu.vector_store %arg2[%c0_3, %c60], %21 {strides = array<i32>} : memref<104x61xf32, #tpu.memory_space<vmem>>, vector<104x1xf32>,
    return
  }
  func.func @transform_0(%arg0: i32) -> (i32, i32) {
    %c0_i32 = arith.constant 0 : i32
    %c0_i32_0 = arith.constant 0 : i32
    return %arg0, %c0_i32 : i32, i32
  }
  func.func @transform_1(%arg0: i32) -> (i32, i32) {
    %c0_i32 = arith.constant 0 : i32
    %c0_i32_0 = arith.constant 0 : i32
    return %arg0, %c0_i32 : i32, i32
  }
}

</mosaic_0001>

<bundles_post_ra>
// kernel: tpu_custom_call.1
= control target key start
LH: loop header
LB: loop body
LE: loop exit
PB: predicated region body
PF: predicated region fallthrough
CT: control target
= control target key end

     0   :  { %s1547_s6 = smov 0   ;;  %s1549_s7 = smov 0   ;;  %s2410_s0 = inlined_call_operand.vmem [shape: s32[200,11], index: 0, kind: input, shape index: {}]   ;;  %s2411_s1 = inlined_call_operand.vmem [shape: f32[200,61], index: 1, kind: output, shape index: {}]  }
   0x1   :  { %s1551_s8 = smov 0  }
   0x2 LB: > { %s1560_s9 = sadd.s32 4294967295, %s1494_s8   ;;  %s1562_s10 = sadd.s32 1, %s1494_s8   ;;  %s1494_s8 = sphi %s1551_s8, %s2457_s8   ;;  %s1490_s7 = sphi %s1549_s7, %s2456_s7   ;;  %s1486_s6 = sphi %s1547_s6, %s2455_s6  }
   0x3   : > { %s41_s11 = ssub.s32 %s1494_s8, %s1562_s10  ;;  %s44_s12 = sadd.s32 1, %s1490_s7 }
   0x4   : > { %p42_p0 = scmp.eq.s32.totalorder %s41_s11, 0  ;;  %p54_p1 = scmp.ne.s32.totalorder %s1490_s7, %s1486_s6 }
   0x5   : > { %p55_p2 = scmp.eq.s32.totalorder %s1560_s9, 1  ;;  %p1269_p3 = scmp.ge.s32.totalorder %s1494_s8, 1 }
   0x6   : > { %s1570_s13 = scalar_select %p42_p0, %s1490_s7, %s44_s12  }
   0x7   : > { %p1572_p4 = por %p55_p2, %p54_p1  ;;  %p96_p5 = scmp.lt.s32.totalorder %s1494_s8, 3 }
   0x9   : > { %p97_p6 = pnand %p1269_p3, %p96_p5 }
   0xa   : > { %s1577_s15 = smul.u32 (!%p97_p6), 13, %s1560_s9  ;;  %s1528_s21 = smov (!%p97_p6), 127  }
   0xb   : > { %100 = sbr.rel (%p97_p6) target bundleno = 600 (0x258), region = 24  ;;  %s1529_s22 = smov (!%p97_p6), 125  }
   0xc   : > { %p124_p7 = scmp.lt.s32.totalorder (!%p97_p6), %s1577_s15, 24  ;;  %s1530_s23 = smov (!%p97_p6), 126  }
   0xd   : > { %s1535_s24 = smov (!%p97_p6), 55   ;;  %s116_s25 = sand.u32 (!%p97_p6), 1, %s1486_s6  }
   0xe   : > { %s1297_s26 = smul.u32 (!%p97_p6), 104, %s116_s25 }
  0x10   : > { %s125_s16 = scalar_select %p124_p7, %s1577_s15, 24  ;;  %v1531_v47 = vmov 0  }
  0x11   : > { %1398 = vset.pattern.permute.xlu0 %v1531_v47  ;;  %1397 = vset.pattern.permute.xlu2 %v1531_v47  ;;  %s2188_s27 = scalar_lea.vmem [#allocation2], %s1297_s26   ;;  %s1008_s28 = ssub.s32 (%p1572_p4), 25, %s1577_s15 }
  0x12   : > { %s1270_s17 = sshll.u32 %s125_s16, 3  ;;  %1396 = vset.pattern.permute.xlu1 %v1531_v47  ;;  %s1296_s29 = smul.u32 (%p1572_p4), 104, %s1560_s9 }
  0x13   : > { %s127_s20 = scalar_lea.vmem %s2410_s0, %s1270_s17  ;;  %p1009_p8 = scmp.lt.s32.totalorder (%p1572_p4), %s1008_s28, 13 }
  0x14   : > { %v1584_v0 = vld [vmem:[%s127_s20 + $0x20] sm:$0xff]  ;;  %v1586_v1 = vld [vmem:[%s127_s20 + $0x10] sm:$0xff]  ;;  %v1596_v3 = vld [vmem:[%s127_s20 + $0x28] sm:$0xff]  ;;  %s2324_s3 = scalar_lea.vmem (%p1572_p4), %s2411_s1, %s1296_s29  }
  0x15   : > { %v1588_v2 = vld [vmem:[%s127_s20] sm:$0xff]  ;;  %159 = vrot.lane.b32.xlu2 %v1584_v0, %s1528_s21  ;;  %155 = vrot.lane.b32.xlu1 %v1586_v1, %s1528_s21  ;;  %v1598_v4 = vld [vmem:[%s127_s20 + $0x18] sm:$0xff] }
  0x16   : > { %151 = vrot.lane.b32.xlu0 %v1588_v2, %s1528_s21  ;;  %v1600_v5 = vld [vmem:[%s127_s20 + $0x8] sm:$0xff]  ;;  %v1608_v6 = vld [vmem:[%s127_s20 + $0x40] sm:$0xff]  ;;  %v1610_v7 = vld [vmem:[%s127_s20 + $0x38] sm:$0xff] }
  0x17   : > { %v1612_v8 = vld [vmem:[%s127_s20 + $0x30] sm:$0xff]  ;;  %v1620_v9 = vld [vmem:[%s127_s20 + $0x58] sm:$0xff]  ;;  %v1624_v11 = vld [vmem:[%s127_s20 + $0x48] sm:$0xff] }
  0x18   : > { %v1622_v10 = vld [vmem:[%s127_s20 + $0x50] sm:$0xff]  ;;  %v1632_v12 = vld [vmem:[%s127_s20 + $0x60] sm:$0xff] }
  0x1d   : > { %161 = vrot.lane.b32.xlu2 %v1596_v3, %s1528_s21  ;;  %157 = vrot.lane.b32.xlu1 %v1598_v4, %s1528_s21 }
  0x1e   : > { %153 = vrot.lane.b32.xlu0 %v1600_v5, %s1528_s21 }
  0x25   : > { %167 = vrot.lane.b32.xlu2 %v1608_v6, %s1528_s21  ;;  %165 = vrot.lane.b32.xlu1 %v1610_v7, %s1528_s21 }
  0x26   : > { %163 = vrot.lane.b32.xlu0 %v1612_v8, %s1528_s21 }
  0x2d   : > { %173 = vrot.lane.b32.xlu2 %v1620_v9, %s1528_s21  ;;  %171 = vrot.lane.b32.xlu1 %v1622_v10, %s1528_s21 }
  0x2e   : > { %169 = vrot.lane.b32.xlu0 %v1624_v11, %s1528_s21 }
  0x35   : > { %270 = vrot.lane.b32.xlu2 %v1600_v5, %s1529_s22  ;;  %268 = vrot.lane.b32.xlu1 %v1588_v2, %s1529_s22 }
  0x36   : > { %175 = vrot.lane.b32.xlu0 %v1632_v12, %s1528_s21 }
  0x3d   : > { %276 = vrot.lane.b32.xlu2 %v1584_v0, %s1529_s22  ;;  %274 = vrot.lane.b32.xlu1 %v1598_v4, %s1529_s22 }
  0x3e   : > { %272 = vrot.lane.b32.xlu0 %v1586_v1, %s1529_s22 }
  0x45   : > { %282 = vrot.lane.b32.xlu2 %v1610_v7, %s1529_s22  ;;  %280 = vrot.lane.b32.xlu1 %v1612_v8, %s1529_s22 }
  0x46   : > { %278 = vrot.lane.b32.xlu0 %v1596_v3, %s1529_s22 }
  0x4d   : > { %288 = vrot.lane.b32.xlu2 %v1622_v10, %s1529_s22  ;;  %286 = vrot.lane.b32.xlu1 %v1624_v11, %s1529_s22 }
  0x4e   : > { %284 = vrot.lane.b32.xlu0 %v1608_v6, %s1529_s22 }
  0x55   : > { %292 = vrot.lane.b32.xlu1 %v1632_v12, %s1529_s22 }
  0x56   : > { %290 = vrot.lane.b32.xlu0 %v1620_v9, %s1529_s22 }
  0x6f   : > { %v1649_v13 = vpop.permute.xlu2 %159 }
  0x77   : > { %v1651_v14 = vpop.permute.xlu2 %161 }
  0x7f   : > { %v1653_v15 = vpop.permute.xlu2 %167 }
  0x87   : > { %v1655_v16 = vpop.permute.xlu2 %173  ;;  %v1657_v17 = vpop.permute.xlu1 %155 }
  0x88   : > { %v1659_v18 = vpop.permute.xlu0 %151 }
  0x8f   : > { %v1661_v19 = vpop.permute.xlu1 %157  ;;  %v271_v20 = vpop.permute.xlu2 %270 }
  0x90   : > { %v308_v21 = vsub.f32 %v1600_v5, %v271_v20  ;;  %v1664_v22 = vpop.permute.xlu0 %153 }
  0x92   : > { %v1666_v23 = vmul.f32 %v308_v21, %v308_v21 }
  0x94   : > { %348 = vrot.lane.b32.xlu0 %v1666_v23, %s1528_s21 }
  0x97   : > { %v1670_v24 = vpop.permute.xlu1 %165  ;;  %v277_v25 = vpop.permute.xlu2 %276 }
  0x98   : > { %v311_v26 = vsub.f32 %v1584_v0, %v277_v25  ;;  %v1673_v27 = vpop.permute.xlu0 %163  ;;  %v660_v25 = vadd.s32 21, %v1588_v2 }
  0x9a   : > { %v1675_v28 = vmul.f32 %v311_v26, %v311_v26  ;;  %v1532_v26 = vmov 1  }
  0x9c   : > { %354 = vrot.lane.b32.xlu0 %v1675_v28, %s1528_s21 }
  0x9f   : > { %v1679_v29 = vpop.permute.xlu1 %171  ;;  %v283_v30 = vpop.permute.xlu2 %282 }
  0xa0   : > { %v314_v31 = vsub.f32 %v1610_v7, %v283_v30  ;;  %v1682_v32 = vpop.permute.xlu0 %169  ;;  %v665_v30 = vadd.s32 21, %v1596_v3 }
  0xa2   : > { %v1684_v33 = vmul.f32 %v314_v31, %v314_v31  ;;  %v668_v31 = vadd.s32 21, %v1608_v6 }
  0xa4   : > { %360 = vrot.lane.b32.xlu0 %v1684_v33, %s1528_s21 }
  0xa7   : > { %v289_v34 = vpop.permute.xlu2 %288  ;;  %v269_v35 = vpop.permute.xlu1 %268 }
  0xa8   : > { %v317_v36 = vsub.f32 %v1622_v10, %v289_v34  ;;  %v307_v37 = vsub.f32 %v1588_v2, %v269_v35  ;;  %v1690_v38 = vpop.permute.xlu0 %175 }
  0xaa   : > { %v1692_v39 = vmul.f32 %v317_v36, %v317_v36  ;;  %v1694_v40 = vmul.f32 %v307_v37, %v307_v37  ;;  %v671_v36 = vadd.s32 21, %v1620_v9 }
  0xac   : > { %346 = vrot.lane.b32.xlu2 %v1694_v40, %s1528_s21  ;;  %366 = vrot.lane.b32.xlu0 %v1692_v39, %s1528_s21 }
  0xaf   : > { %v275_v41 = vpop.permute.xlu1 %274 }
  0xb0   : > { %v310_v42 = vsub.f32 %v1598_v4, %v275_v41  ;;  %v273_v43 = vpop.permute.xlu0 %272 }
  0xb1   : > { %v309_v44 = vsub.f32 %v1586_v1, %v273_v43  ;;  %v1533_v43 = vmov 2  }
  0xb2   : > { %v1702_v45 = vmul.f32 %v310_v42, %v310_v42  ;;  %v739_v42 = vadd.s32 42, %v1600_v5 }
  0xb3   : > { %v1704_v46 = vmul.f32 %v309_v44, %v309_v44 }
  0xb4   : > { %352 = vrot.lane.b32.xlu2 %v1702_v45, %s1528_s21  ;;  %398 = vrot.lane.b32.xlu0 %v1694_v40, %s1530_s23 }
  0xb5   : > { %350 = vrot.lane.b32.xlu1 %v1704_v46, %s1528_s21 }
  0xb7   : > { %v281_v48 = vpop.permute.xlu1 %280 }
  0xb8   : > { %v313_v49 = vsub.f32 %v1612_v8, %v281_v48  ;;  %v279_v50 = vpop.permute.xlu0 %278  ;;  %v662_v48 = vadd.s32 21, %v1586_v1 }
  0xb9   : > { %v312_v51 = vsub.f32 %v1596_v3, %v279_v50  ;;  %v744_v50 = vadd.s32 42, %v1612_v8 }
  0xba   : > { %v1714_v52 = vmul.f32 %v313_v49, %v313_v49  ;;  %v661_v49 = vadd.s32 21, %v1600_v5 }
  0xbb   : > { %v1716_v53 = vmul.f32 %v312_v51, %v312_v51 }
  0xbc   : > { %358 = vrot.lane.b32.xlu2 %v1714_v52, %s1528_s21  ;;  %404 = vrot.lane.b32.xlu0 %v1702_v45, %s1530_s23 }
  0xbd   : > { %356 = vrot.lane.b32.xlu1 %v1716_v53, %s1528_s21 }
  0xbf   : > { %v287_v54 = vpop.permute.xlu1 %286 }
  0xc0   : > { %v316_v55 = vsub.f32 %v1624_v11, %v287_v54  ;;  %v285_v56 = vpop.permute.xlu0 %284 }
  0xc1   : > { %v315_v57 = vsub.f32 %v1608_v6, %v285_v56  ;;  %v663_v56 = vadd.s32 21, %v1598_v4 }
  0xc2   : > { %v1726_v58 = vmul.f32 %v316_v55, %v316_v55  ;;  %v664_v55 = vadd.s32 21, %v1584_v0 }
  0xc3   : > { %v1728_v59 = vmul.f32 %v315_v57, %v315_v57  ;;  %v747_v57 = vadd.s32 42, %v1624_v11 }
  0xc4   : > { %364 = vrot.lane.b32.xlu2 %v1726_v58, %s1528_s21  ;;  %410 = vrot.lane.b32.xlu0 %v1714_v52, %s1530_s23 }
  0xc5   : > { %362 = vrot.lane.b32.xlu1 %v1728_v59, %s1528_s21 }
  0xc7   : > { %v293_v60 = vpop.permute.xlu1 %292 }
  0xc8   : > { %v319_v61 = vsub.f32 %v1632_v12, %v293_v60  ;;  %v291_v62 = vpop.permute.xlu0 %290  ;;  %v179_v60 = vsub.s32 %v1586_v1, %v1657_v17  ;;  %v750_v17 = vadd.s32 42, %v1632_v12 }
  0xc9   : > { %v318_v63 = vsub.f32 %v1620_v9, %v291_v62 }
  0xca   : > { %v1738_v20 = vmul.f32 %v319_v61, %v319_v61  ;;  %vm196_vm0 = vcmp.lt.s32.totalorder %v179_v60, 0 }
  0xcb   : > { %v1740_v21 = vmul.f32 %v318_v63, %v318_v63 }
  0xcc   : > { %370 = vrot.lane.b32.xlu2 %v1738_v20, %s1528_s21  ;;  %416 = vrot.lane.b32.xlu0 %v1726_v58, %s1530_s23 }
  0xcd   : > { %368 = vrot.lane.b32.xlu1 %v1740_v21, %s1528_s21 }
  0xd4   : > { %422 = vrot.lane.b32.xlu0 %v1738_v20, %s1530_s23  ;;  %402 = vrot.lane.b32.xlu2 %v1704_v46, %s1530_s23 }
  0xd5   : > { %400 = vrot.lane.b32.xlu1 %v1666_v23, %s1530_s23 }
  0xdc   : > { %615 = vperm.xlu0 %1398, %v1586_v1   ;;  %408 = vrot.lane.b32.xlu2 %v1716_v53, %s1530_s23 }
  0xdd   : > { %406 = vrot.lane.b32.xlu1 %v1675_v28, %s1530_s23 }
  0xe4   : > { %630 = vperm.xlu0 %1398, %v1610_v7   ;;  %414 = vrot.lane.b32.xlu2 %v1728_v59, %s1530_s23 }
  0xe5   : > { %412 = vrot.lane.b32.xlu1 %v1684_v33, %s1530_s23 }
  0xec   : > { %639 = vperm.xlu0 %1398, %v1622_v10   ;;  %420 = vrot.lane.b32.xlu2 %v1740_v21, %s1530_s23 }
  0xed   : > { %418 = vrot.lane.b32.xlu1 %v1692_v39, %s1530_s23 }
  0xf4   : > { %1399 = vset.pattern.permute.xlu0 %v1532_v26  ;;  %612 = vperm.xlu2 %1397, %v1600_v5  }
  0xf5   : > { %609 = vperm.xlu1 %1396, %v1588_v2   ;;  %674 = vperm.xlu0 %1399, %v660_v25  }
  0xfc   : > { %621 = vperm.xlu2 %1397, %v1584_v0  }
  0xfd   : > { %618 = vperm.xlu1 %1396, %v1598_v4   ;;  %689 = vperm.xlu0 %1399, %v665_v30   ;;  %v197_v30 = vsub.s32 0, %v179_v60 }
 0x104   : > { %627 = vperm.xlu2 %1397, %v1612_v8  }
 0x105   : > { %624 = vperm.xlu1 %1396, %v1596_v3   ;;  %698 = vperm.xlu0 %1399, %v668_v31   ;;  %v667_v31 = vadd.s32 21, %v1610_v7 }
 0x106   : > { %v347_v34 = vpop.permute.xlu2 %346  ;;  %v1778_v35 = vpop.permute.xlu0 %348 }
 0x107   : > { %v385_v61 = vadd.f32 %v347_v34, %v1694_v40  ;;  %v184_v40 = vsub.s32 %v1610_v7, %v1670_v24  ;;  %v198_v34 = vsel %vm196_vm0, %v197_v30, %v179_v60  ;;  %v670_v24 = vadd.s32 21, %v1622_v10 }
 0x108   : > { %vm233_vm1 = vcmp.lt.s32.totalorder %v198_v34, 10 }
 0x109   : > { %vm211_vm2 = vcmp.lt.s32.totalorder %v184_v40, 0 }
 0x10c   : > { %636 = vperm.xlu2 %1397, %v1624_v11  }
 0x10d   : > { %633 = vperm.xlu1 %1396, %v1608_v6   ;;  %707 = vperm.xlu0 %1399, %v671_v36   ;;  %v666_v36 = vadd.s32 21, %v1612_v8 }
 0x10e   : > { %v353_v37 = vpop.permute.xlu2 %352  ;;  %v1783_v41 = vpop.permute.xlu0 %354 }
 0x114   : > { %645 = vperm.xlu2 %1397, %v1632_v12  }
 0x115   : > { %642 = vperm.xlu1 %1396, %v1620_v9   ;;  %1403 = vset.pattern.permute.xlu0 %v1533_v43 }
 0x116   : > { %v359_v44 = vpop.permute.xlu2 %358  ;;  %v1789_v47 = vpop.permute.xlu0 %360  ;;  %755 = vperm.xlu0 %1403, %v739_v42   ;;  %v388_v42 = vadd.f32 %v353_v37, %v1702_v45  ;;  %v669_v45 = vadd.s32 21, %v1624_v11 }
 0x117   : > { %v391_v30 = vadd.f32 %v359_v44, %v1714_v52  ;;  %v672_v44 = vadd.s32 21, %v1632_v12 }
 0x11c   : > { %1401 = vset.pattern.permute.xlu2 %v1532_v26 }
 0x11d   : > { %1400 = vset.pattern.permute.xlu1 %v1532_v26  ;;  %680 = vperm.xlu2 %1401, %v662_v48  }
 0x11e   : > { %677 = vperm.xlu1 %1400, %v661_v49   ;;  %v1794_v51 = vpop.permute.xlu2 %364  ;;  %v1796_v54 = vpop.permute.xlu0 %366  ;;  %770 = vperm.xlu0 %1403, %v744_v50  }
 0x125   : > { %686 = vperm.xlu2 %1401, %v664_v55  }
 0x126   : > { %683 = vperm.xlu1 %1400, %v663_v56   ;;  %v1804_v62 = vpop.permute.xlu2 %370  ;;  %v399_v63 = vpop.permute.xlu0 %398  ;;  %779 = vperm.xlu0 %1403, %v747_v57   ;;  %v212_v56 = vsub.s32 0, %v184_v40 }
 0x127   : > { %v351_v25 = vpop.permute.xlu1 %350  ;;  %v1806_v26 = vadd.f32 %v399_v63, %v385_v61 }
 0x128   : > { %v387_v48 = vadd.f32 %v351_v25, %v1704_v46  ;;  %v234_v46 = vsel %vm233_vm1, %v198_v34, 10  ;;  %v213_v60 = vsel %vm211_vm2, %v212_v56, %v184_v40  ;;  %v187_v25 = vsub.s32 %v1622_v10, %v1679_v29 }
 0x129   : > { %1408 = vrsqrt.f32 %v1806_v26  ;;  %vm243_vm3 = vcmp.lt.s32.totalorder %v213_v60, 10  ;;  %v738_v56 = vadd.s32 42, %v1588_v2  ;;  %vm457_vm6 = vcmp.eq.f32.partialorder %v1806_v26, inf }
 0x12a   : > { %v221_v52 = vsub.s32 0, %v187_v25  ;;  %vm220_vm4 = vcmp.lt.s32.totalorder %v187_v25, 0  ;;  %vm459_vm7 = vcmp.eq.f32.partialorder %v1806_v26, 0.0 }
 0x12d   : > { %695 = vperm.xlu2 %1401, %v667_v31  }
 0x12e   : > { %692 = vperm.xlu1 %1400, %v666_v36   ;;  %v403_v49 = vpop.permute.xlu2 %402  ;;  %v405_v50 = vpop.permute.xlu0 %404  ;;  %788 = vperm.xlu0 %1403, %v750_v17   ;;  %v818_v36 = vadd.s32 49, %v234_v46  ;;  %v394_v46 = vadd.f32 %v1794_v51, %v1726_v58  ;;  %v741_v58 = vadd.s32 42, %v1598_v4 }
 0x12f   : > { %v1409_v55 = vpop.eup %1408  ;;  %v1816_v57 = vadd.f32 %v403_v49, %v387_v48  ;;  %v357_v61 = vpop.permute.xlu1 %356  ;;  %v1818_v63 = vadd.f32 %v405_v50, %v388_v42  ;;  %v1534_v48 = vmov 3  }
 0x130   : > { %v451_v37 = vmul.f32 %v1409_v55, %v1806_v26  ;;  %v390_v31 = vadd.f32 %v357_v61, %v1716_v53  ;;  %v244_v53 = vsel %vm243_vm3, %v213_v60, 10 }
 0x131   : > { %1410 = vrsqrt.f32 %v1818_v63  ;;  %vm493_vm8 = vcmp.eq.f32.partialorder %v1818_v63, inf  ;;  %vm495_vm9 = vcmp.eq.f32.partialorder %v1818_v63, 0.0 }
 0x132   : > { %v452_v34 = vmul.f32 %v1409_v55, %v451_v37 }
 0x134   : > { %v453_v61 = vmul.f32 0.5, %v452_v34 }
 0x135   : > { %704 = vperm.xlu2 %1401, %v670_v24  }
 0x136   : > { %701 = vperm.xlu1 %1400, %v669_v45   ;;  %v409_v17 = vpop.permute.xlu2 %408  ;;  %v411_v42 = vpop.permute.xlu0 %410  ;;  %1407 = vset.pattern.permute.xlu0 %v1534_v48  ;;  %v222_v45 = vsel %vm220_vm4, %v221_v52, %v187_v25 }
 0x137   : > { %v1829_v49 = vadd.f32 %v409_v17, %v390_v31  ;;  %v363_v40 = vpop.permute.xlu1 %362  ;;  %v1831_v50 = vadd.f32 %v411_v42, %v391_v30  ;;  %836 = vperm.xlu0 %1407, %v818_v36   ;;  %v1411_v29 = vpop.eup %1410  ;;  %v823_v30 = vadd.s32 49, %v244_v53  ;;  %v454_v36 = vsub.f32 1.5, %v453_v61 }
 0x138   : > { %v487_v24 = vmul.f32 %v1411_v29, %v1818_v63  ;;  %v393_v37 = vadd.f32 %v363_v40, %v1728_v59  ;;  %vm249_vm5 = vcmp.lt.s32.totalorder %v222_v45, 10  ;;  %v740_v40 = vadd.s32 42, %v1586_v1 }
 0x139   : > { %1412 = vrsqrt.f32 %v1831_v50  ;;  %v250_v59 = vsel %vm249_vm5, %v222_v45, 10  ;;  %v455_v51 = vmul.f32 %v1409_v55, %v454_v36  ;;  %vm529_vm12 = vcmp.eq.f32.partialorder %v1831_v50, inf }
 0x13a   : > { %v488_v25 = vmul.f32 %v1411_v29, %v487_v24  ;;  %vm531_vm13 = vcmp.eq.f32.partialorder %v1831_v50, 0.0 }
 0x13b   : > { %v456_v55 = vmul.f32 %v455_v51, %v1806_v26 }
 0x13c   : > { %v489_v53 = vmul.f32 0.5, %v488_v25  ;;  %v460_v25 = vand.u32 2147483648, %v1806_v26 }
 0x13d   : > { %1402 = vset.pattern.permute.xlu2 %v1533_v43 }
 0x13e   : > { %710 = vperm.xlu1 %1400, %v672_v44   ;;  %v415_v60 = vpop.permute.xlu2 %414  ;;  %v417_v31 = vpop.permute.xlu0 %416  ;;  %752 = vperm.xlu2 %1402, %v738_v56   ;;  %v397_v56 = vadd.f32 %v1804_v62, %v1738_v20 }
 0x13f   : > { %v1841_v17 = vadd.f32 %v415_v60, %v393_v37  ;;  %v369_v42 = vpop.permute.xlu1 %368  ;;  %v1843_v34 = vadd.f32 %v417_v31, %v394_v46  ;;  %851 = vperm.xlu0 %1407, %v823_v30   ;;  %v1413_v52 = vpop.eup %1412  ;;  %v826_v46 = vadd.s32 49, %v250_v59  ;;  %v490_v60 = vsub.f32 1.5, %v489_v53 }
 0x140   : > { %v523_v44 = vmul.f32 %v1413_v52, %v1831_v50  ;;  %v396_v61 = vadd.f32 %v369_v42, %v1740_v21  ;;  %v742_v21 = vadd.s32 42, %v1584_v0  ;;  %v458_v31 = vsel %vm457_vm6, %v1806_v26, %v456_v55 }
 0x141   : > { %1414 = vrsqrt.f32 %v1843_v34  ;;  %v491_v36 = vmul.f32 %v1411_v29, %v490_v60  ;;  %v746_v26 = vadd.s32 42, %v1608_v6  ;;  %v178_v60 = vsub.s32 %v1600_v5, %v1664_v22 }
 0x142   : > { %v524_v20 = vmul.f32 %v1413_v52, %v523_v44  ;;  %vm565_vm2 = vcmp.eq.f32.partialorder %v1843_v34, inf  ;;  %vm567_vm3 = vcmp.eq.f32.partialorder %v1843_v34, 0.0 }
 0x143   : > { %v492_v29 = vmul.f32 %v491_v36, %v1818_v63  ;;  %v194_v22 = vsub.s32 0, %v178_v60  ;;  %vm193_vm11 = vcmp.lt.s32.totalorder %v178_v60, 0 }
 0x144   : > { %v525_v42 = vmul.f32 0.5, %v524_v20  ;;  %v496_v20 = vand.u32 2147483648, %v1818_v63 }
 0x146   : > { %1404 = vset.pattern.permute.xlu1 %v1533_v43  ;;  %v421_v24 = vpop.permute.xlu2 %420  ;;  %v423_v37 = vpop.permute.xlu0 %422  ;;  %761 = vperm.xlu2 %1402, %v741_v58   ;;  %v743_v43 = vadd.s32 42, %v1596_v3  ;;  %v526_v44 = vsub.f32 1.5, %v525_v42 }
 0x147   : > { %v1854_v45 = vadd.f32 %v421_v24, %v396_v61  ;;  %758 = vperm.xlu1 %1404, %v740_v40   ;;  %v1856_v1 = vpop.permute.xlu1 %400  ;;  %v1858_v30 = vadd.f32 %v423_v37, %v397_v56  ;;  %860 = vperm.xlu0 %1407, %v826_v46   ;;  %v1415_v62 = vpop.eup %1414  ;;  %v461_v40 = vsel %vm459_vm7, %v460_v25, %v458_v31  ;;  %v745_v24 = vadd.s32 42, %v1610_v7 }
 0x148   : > { %v559_v58 = vmul.f32 %v1415_v62, %v1843_v34  ;;  %v177_v46 = vsub.s32 %v1588_v2, %v1659_v18  ;;  %v494_v37 = vsel %vm493_vm8, %v1818_v63, %v492_v29  ;;  %v527_v55 = vmul.f32 %v1413_v52, %v526_v44 }
 0x149   : > { %1416 = vrsqrt.f32 %v1858_v30  ;;  %v497_v7 = vsel %vm495_vm9, %v496_v20, %v494_v37  ;;  %v181_v63 = vsub.s32 %v1584_v0, %v1649_v13  ;;  %v749_v25 = vadd.s32 42, %v1620_v9 }
 0x14a   : > { %v560_v56 = vmul.f32 %v1415_v62, %v559_v58  ;;  %v191_v18 = vsub.s32 0, %v177_v46  ;;  %v528_v5 = vmul.f32 %v527_v55, %v1831_v50  ;;  %vm190_vm10 = vcmp.lt.s32.totalorder %v177_v46, 0 }
 0x14b   : > { %v748_v29 = vadd.s32 42, %v1622_v10  ;;  %vm202_vm14 = vcmp.lt.s32.totalorder %v181_v63, 0  ;;  %v203_v55 = vsub.s32 0, %v181_v63  ;;  %1418 = vrsqrt.f32 %v1816_v57 }
 0x14c   : > { %v192_v58 = vsel %vm190_vm10, %v191_v18, %v177_v46  ;;  %v530_v44 = vsel %vm529_vm12, %v1831_v50, %v528_v5  ;;  %v183_v18 = vsub.s32 %v1612_v8, %v1673_v27  ;;  %vm603_vm12 = vcmp.eq.f32.partialorder %v1858_v30, 0.0 }
 0x14d   : > { %vm229_vm15 = vcmp.lt.s32.totalorder %v192_v58, 10 }
 0x14e   : > { %v1868_v59 = vpop.permute.xlu2 %612  ;;  %767 = vperm.xlu2 %1402, %v743_v43   ;;  %v1870_v51 = vpop.permute.xlu0 %615  ;;  %vm208_vm9 = vcmp.lt.s32.totalorder %v183_v18, 0 }
 0x14f   : > { %764 = vperm.xlu1 %1404, %v742_v21   ;;  %v1872_v53 = vpop.permute.xlu1 %406  ;;  %947 = vrot.lane.b32.xlu0 %v461_v40, %s1535_s24  ;;  %v1876_v61 = vpop.eup %1416  ;;  %v561_v21 = vmul.f32 0.5, %v560_v56  ;;  %v180_v40 = vsub.s32 %v1598_v4, %v1661_v19  ;;  %v195_v56 = vsel %vm193_vm11, %v194_v22, %v178_v60  ;;  %v606_v19 = vlaneseq }
 0x150   : > { %v595_v43 = vmul.f32 %v1876_v61, %v1858_v30  ;;  %vm231_vm0 = vcmp.lt.s32.totalorder %v195_v56, 10  ;;  %v182_v60 = vsub.s32 %v1596_v3, %v1651_v14  ;;  %v568_v14 = vand.u32 2147483648, %v1843_v34 }
 0x151   : > { %v562_v36 = vsub.f32 1.5, %v561_v21  ;;  %v200_v4 = vsub.s32 0, %v180_v40  ;;  %vm199_vm1 = vcmp.lt.s32.totalorder %v180_v40, 0  ;;  %v232_v20 = vsel %vm231_vm0, %v195_v56, 10 }
 0x152   : > { %v596_v42 = vmul.f32 %v1876_v61, %v595_v43  ;;  %v204_v21 = vsel %vm202_vm14, %v203_v55, %v181_v63  ;;  %v1923_v5 = vand.u32 127, %v606_v19  ;;  %v817_v3 = vadd.s32 49, %v232_v20 }
 0x153   : > { %v201_v43 = vsel %vm199_vm1, %v200_v4, %v180_v40  ;;  %v206_v63 = vsub.s32 0, %v182_v60  ;;  %vm237_vm5 = vcmp.lt.s32.totalorder %v204_v21, 10  ;;  %vm205_vm8 = vcmp.lt.s32.totalorder %v182_v60, 0 }
 0x154   : > { %v597_v37 = vmul.f32 0.5, %v596_v42  ;;  %v386_v42 = vadd.f32 %v1778_v35, %v1666_v23  ;;  %vm235_vm4 = vcmp.lt.s32.totalorder %v201_v43, 10  ;;  %v209_v35 = vsub.s32 0, %v183_v18 }
 0x155   : > { %v236_v40 = vsel %vm235_vm4, %v201_v43, 10  ;;  %vm601_vm11 = vcmp.eq.f32.partialorder %v1858_v30, inf  ;;  %v186_v56 = vsub.s32 %v1624_v11, %v1682_v32  ;;  %v604_v55 = vand.u32 2147483648, %v1858_v30 }
 0x156   : > { %v1890_v31 = vpop.permute.xlu2 %621  ;;  %776 = vperm.xlu2 %1402, %v746_v26   ;;  %v1892_v2 = vpop.permute.xlu0 %630  ;;  %v532_v26 = vand.u32 2147483648, %v1831_v50  ;;  %v1935_v8 = vadd.f32 %v1856_v1, %v386_v42  ;;  %v238_v1 = vsel %vm237_vm5, %v204_v21, 10  ;;  %v819_v19 = vadd.s32 49, %v236_v40 }
 0x157   : > { %773 = vperm.xlu1 %1404, %v745_v24   ;;  %v1894_v52 = vpop.permute.xlu1 %412  ;;  %953 = vrot.lane.b32.xlu0 %v497_v7, %s1535_s24  ;;  %v563_v24 = vmul.f32 %v1415_v62, %v562_v36  ;;  %v598_v62 = vsub.f32 1.5, %v597_v37  ;;  %v230_v7 = vsel %vm229_vm15, %v192_v58, 10  ;;  %v389_v37 = vadd.f32 %v1783_v41, %v1675_v28 }
 0x158   : > { %v533_v46 = vsel %vm531_vm13, %v532_v26, %v530_v44  ;;  %v816_v58 = vadd.s32 49, %v230_v7  ;;  %1420 = vrsqrt.f32 %v1935_v8  ;;  %v210_v44 = vsel %vm208_vm9, %v209_v35, %v183_v18 }
 0x159   : > { %v564_v50 = vmul.f32 %v563_v24, %v1843_v34  ;;  %v599_v36 = vmul.f32 %v1876_v61, %v598_v62  ;;  %v185_v24 = vsub.s32 %v1608_v6, %v1653_v15  ;;  %v1963_v11 = vadd.f32 %v1872_v53, %v389_v37 }
 0x15a   : > { %vm241_vm13 = vcmp.lt.s32.totalorder %v210_v44, 10  ;;  %v218_v28 = vsub.s32 0, %v186_v56  ;;  %vm217_vm15 = vcmp.lt.s32.totalorder %v186_v56, 0  ;;  %1422 = vrsqrt.f32 %v1829_v49 }
 0x15b   : > { %v566_v22 = vsel %vm565_vm2, %v1843_v34, %v564_v50  ;;  %v600_v34 = vmul.f32 %v599_v36, %v1858_v30  ;;  %v1960_v50 = vpop.eup %1418  ;;  %v215_v62 = vsub.s32 0, %v185_v24  ;;  %vm214_vm0 = vcmp.lt.s32.totalorder %v185_v24, 0 }
 0x15c   : > { %v569_v61 = vsel %vm567_vm3, %v568_v14, %v566_v22  ;;  %v475_v53 = vmul.f32 %v1960_v50, %v1816_v57  ;;  %1424 = vrsqrt.f32 %v1963_v11  ;;  %v219_v21 = vsel %vm217_vm15, %v218_v28, %v186_v56 }
 0x15d   : > { %v602_v26 = vsel %vm601_vm11, %v1858_v30, %v600_v34  ;;  %v242_v30 = vsel %vm241_vm13, %v210_v44, 10  ;;  %v189_v43 = vsub.s32 %v1632_v12, %v1690_v38  ;;  %v216_v18 = vsel %vm214_vm0, %v215_v62, %v185_v24 }
 0x15e   : > { %v1909_v0 = vpop.permute.xlu2 %627  ;;  %785 = vperm.xlu2 %1402, %v749_v25   ;;  %v1911_v13 = vpop.permute.xlu0 %639  ;;  %v605_v6 = vsel %vm603_vm12, %v604_v55, %v602_v26  ;;  %v392_v22 = vadd.f32 %v1789_v47, %v1684_v33  ;;  %v822_v36 = vadd.s32 49, %v242_v30  ;;  %vm247_vm2 = vcmp.lt.s32.totalorder %v219_v21, 10 }
 0x15f   : > { %782 = vperm.xlu1 %1404, %v748_v29   ;;  %v1913_v10 = vpop.permute.xlu1 %418  ;;  %959 = vrot.lane.b32.xlu0 %v533_v46, %s1535_s24  ;;  %v207_v29 = vsel %vm205_vm8, %v206_v63, %v182_v60  ;;  %v820_v46 = vadd.s32 49, %v238_v1  ;;  %v1968_v41 = vpop.eup %1420  ;;  %v188_v60 = vsub.s32 %v1620_v9, %v1655_v16  ;;  %v476_v9 = vmul.f32 %v1960_v50, %v475_v53 }
 0x160   : > { %vm239_vm14 = vcmp.lt.s32.totalorder %v207_v29, 10  ;;  %v463_v7 = vmul.f32 %v1968_v41, %v1935_v8  ;;  %v1989_v12 = vpop.eup %1422  ;;  %v227_v38 = vsub.s32 0, %v189_v43  ;;  %vm245_vm4 = vcmp.lt.s32.totalorder %v216_v18, 10 }
 0x161   : > { %v240_v20 = vsel %vm239_vm14, %v207_v29, 10  ;;  %v224_v16 = vsub.s32 0, %v188_v60  ;;  %vm223_vm5 = vcmp.lt.s32.totalorder %v188_v60, 0  ;;  %1426 = vrsqrt.f32 %v1841_v17 }
 0x162   : > { %v821_v42 = vadd.s32 49, %v240_v20  ;;  %v464_v47 = vmul.f32 %v1968_v41, %v463_v7  ;;  %v511_v35 = vmul.f32 %v1989_v12, %v1829_v49  ;;  %v395_v44 = vadd.f32 %v1796_v54, %v1692_v39 }
 0x163   : > { %v225_v34 = vsel %vm223_vm5, %v224_v16, %v188_v60  ;;  %vm651_vm14 = vcmp.eq.s32.totalorder %v1923_v5, %v1890_v31  ;;  %vm469_vm5 = vcmp.eq.f32.partialorder %v1935_v8, inf  ;;  %v2434_v28 = vmov 0 }
 0x164   : > { %v465_v40 = vmul.f32 0.5, %v464_v47  ;;  %v2011_v37 = vadd.f32 %v1913_v10, %v395_v44  ;;  %vm251_vm9 = vcmp.lt.s32.totalorder %v225_v34, 10 }
 0x165   : > { %v252_v60 = vsel %vm251_vm9, %v225_v34, 10  ;;  %vm517_vm9 = vcmp.eq.f32.partialorder %v1829_v49, inf }
 0x166   : > { %v1930_v25 = vpop.permute.xlu2 %636  ;;  %1406 = vset.pattern.permute.xlu2 %v1534_v48  ;;  %v466_v54 = vsub.f32 1.5, %v465_v40 }
 0x167   : > { %1405 = vset.pattern.permute.xlu1 %v1534_v48  ;;  %v610_v27 = vpop.permute.xlu1 %609  ;;  %833 = vperm.xlu2 %1406, %v817_v3   ;;  %v675_v23 = vpop.permute.xlu0 %674  ;;  %v1985_v3 = vadd.f32 %v1894_v52, %v392_v22  ;;  %v827_v22 = vadd.s32 49, %v252_v60 }
 0x168   : > { %vm647_vm6 = vcmp.eq.s32.totalorder %v1923_v5, %v610_v27  ;;  %830 = vperm.xlu1 %1405, %v816_v58   ;;  %965 = vrot.lane.b32.xlu0 %v569_v61, %s1535_s24  ;;  %vm712_vm7 = vcmp.eq.s32.totalorder %v1923_v5, %v675_v23  ;;  %v1993_v58 = vpop.eup %1424  ;;  %v248_v27 = vsel %vm247_vm2, %v219_v21, 10  ;;  %v477_v61 = vmul.f32 0.5, %v476_v9 }
 0x169   : > { %vm1943_vm10 = vmor %vm647_vm6, %vm712_vm7  ;;  %vm226_vm6 = vcmp.lt.s32.totalorder %v189_v43, 0  ;;  %1428 = vrsqrt.f32 %v1985_v3  ;;  %v246_v23 = vsel %vm245_vm4, %v216_v18, 10  ;;  %v499_v29 = vmul.f32 %v1993_v58, %v1963_v11 }
 0x16a   : > { %v228_v1 = vsel %vm226_vm6, %v227_v38, %v189_v43  ;;  %v825_v56 = vadd.s32 49, %v248_v27  ;;  %v824_v26 = vadd.s32 49, %v246_v23  ;;  %v478_v24 = vsub.f32 1.5, %v477_v61 }
 0x16b   : > { %vm253_vm11 = vcmp.lt.s32.totalorder %v228_v1, 10  ;;  %1430 = vrsqrt.f32 %v1854_v45  ;;  %v467_v21 = vmul.f32 %v1968_v41, %v466_v54  ;;  %vm481_vm4 = vcmp.eq.f32.partialorder %v1816_v57, inf }
 0x16c   : > { %v254_v30 = vsel %vm253_vm11, %v228_v1, 10  ;;  %v479_v53 = vmul.f32 %v1960_v50, %v478_v24  ;;  %1432 = vrsqrt.f32 %v2011_v37  ;;  %v472_v24 = vand.u32 2147483648, %v1935_v8 }
 0x16d   : > { %v828_v18 = vadd.s32 49, %v254_v30  ;;  %v468_v38 = vmul.f32 %v467_v21, %v1935_v8  ;;  %vm483_vm6 = vcmp.eq.f32.partialorder %v1816_v57, 0.0  ;;  %vm505_vm11 = vcmp.eq.f32.partialorder %v1963_v11, inf }
 0x16e   : > { %v1957_v4 = vpop.permute.xlu2 %645  ;;  %v480_v50 = vmul.f32 %v479_v53, %v1816_v57  ;;  %v520_v21 = vand.u32 2147483648, %v1829_v49 }
 0x16f   : > { %v1965_v32 = vpop.permute.xlu1 %618  ;;  %842 = vperm.xlu2 %1406, %v820_v46   ;;  %v690_v15 = vpop.permute.xlu0 %689 }
 0x170   : > { %839 = vperm.xlu1 %1405, %v819_v19   ;;  %971 = vrot.lane.b32.xlu0 %v605_v6, %s1535_s24  ;;  %vm717_vm1 = vcmp.eq.s32.totalorder %v1923_v5, %v690_v15  ;;  %v512_v19 = vmul.f32 %v1989_v12, %v511_v35  ;;  %v2014_v6 = vpop.eup %1426  ;;  %v500_v15 = vmul.f32 %v1993_v58, %v499_v29  ;;  %v484_v35 = vand.u32 2147483648, %v1816_v57 }
 0x171   : > { %v2019_v10 = vpop.eup %1428  ;;  %v547_v20 = vmul.f32 %v2014_v6, %v1841_v17  ;;  %v482_v23 = vsel %vm481_vm4, %v1816_v57, %v480_v50  ;;  %v470_v29 = vsel %vm469_vm5, %v1935_v8, %v468_v38  ;;  %vm553_vm5 = vcmp.eq.f32.partialorder %v1841_v17, inf }
 0x172   : > { %v513_v31 = vmul.f32 0.5, %v512_v19  ;;  %v501_v43 = vmul.f32 0.5, %v500_v15  ;;  %v535_v7 = vmul.f32 %v2019_v10, %v1985_v3 }
 0x173   : > { %v548_v16 = vmul.f32 %v2014_v6, %v547_v20 }
 0x174   : > { %v514_v9 = vsub.f32 1.5, %v513_v31  ;;  %v536_v47 = vmul.f32 %v2019_v10, %v535_v7 }
 0x175   : > { %v549_v1 = vmul.f32 0.5, %v548_v16 }
 0x176   : > { %v515_v34 = vmul.f32 %v1989_v12, %v514_v9 }
 0x177   : > { %v625_v14 = vpop.permute.xlu1 %624  ;;  %v1987_v63 = vpop.permute.xlu2 %680  ;;  %848 = vperm.xlu2 %1406, %v822_v36  }
 0x178   : > { %vm652_vm3 = vcmp.eq.s32.totalorder %v1923_v5, %v625_v14  ;;  %845 = vperm.xlu1 %1405, %v821_v42   ;;  %v699_v33 = vpop.permute.xlu0 %698  ;;  %v2047_v14 = vpop.eup %1430  ;;  %v516_v19 = vmul.f32 %v515_v34, %v1829_v49 }
 0x179   : > { %vm1997_vm7 = vmor %vm652_vm3, %vm717_vm1  ;;  %vm720_vm8 = vcmp.eq.s32.totalorder %v1923_v5, %v699_v33  ;;  %v502_v33 = vsub.f32 1.5, %v501_v43  ;;  %v2054_v27 = vpop.eup %1432  ;;  %v583_v40 = vmul.f32 %v2047_v14, %v1854_v45 }
 0x17a   : > { %v518_v53 = vsel %vm517_vm9, %v1829_v49, %v516_v19  ;;  %vm555_vm9 = vcmp.eq.f32.partialorder %v1841_v17, 0.0 }
 0x17b   : > { %v503_v44 = vmul.f32 %v1993_v58, %v502_v33  ;;  %v584_v58 = vmul.f32 %v2047_v14, %v583_v40 }
 0x17d   : > { %v504_v57 = vmul.f32 %v503_v44, %v1963_v11  ;;  %v585_v31 = vmul.f32 0.5, %v584_v58 }
 0x17f   : > { %v634_v46 = vpop.permute.xlu1 %633  ;;  %v687_v55 = vpop.permute.xlu2 %686  ;;  %857 = vperm.xlu2 %1406, %v825_v56   ;;  %v537_v56 = vmul.f32 0.5, %v536_v47  ;;  %v506_v20 = vsel %vm505_vm11, %v1963_v11, %v504_v57 }
 0x180   : > { %vm655_vm12 = vcmp.eq.s32.totalorder %v1923_v5, %v634_v46  ;;  %vm716_vm13 = vcmp.eq.s32.totalorder %v1923_v5, %v687_v55  ;;  %854 = vperm.xlu1 %1405, %v824_v26   ;;  %v708_v39 = vpop.permute.xlu0 %707  ;;  %v571_v26 = vmul.f32 %v2054_v27, %v2011_v37  ;;  %v485_v46 = vsel %vm483_vm6, %v484_v35, %v482_v23 }
 0x181   : > { %vm2025_vm15 = vmor %vm655_vm12, %vm720_vm8  ;;  %vm723_vm1 = vcmp.eq.s32.totalorder %v1923_v5, %v708_v39  ;;  %vm471_vm8 = vcmp.eq.f32.partialorder %v1935_v8, 0.0  ;;  %v550_v39 = vsub.f32 1.5, %v549_v1  ;;  %v538_v8 = vsub.f32 1.5, %v537_v56 }
 0x182   : > { %vm2030_vm0 = vmor %vm651_vm14, %vm716_vm13  ;;  %v473_v55 = vsel %vm471_vm8, %v472_v24, %v470_v29  ;;  %v572_v30 = vmul.f32 %v2054_v27, %v571_v26  ;;  %vm519_vm12 = vcmp.eq.f32.partialorder %v1829_v49, 0.0  ;;  %vm507_vm13 = vcmp.eq.f32.partialorder %v1963_v11, 0.0 }
 0x183   : > { %v551_v60 = vmul.f32 %v2014_v6, %v550_v39  ;;  %v539_v43 = vmul.f32 %v2019_v10, %v538_v8  ;;  %vm650_vm14 = vcmp.eq.s32.totalorder %v1923_v5, %v1965_v32  ;;  %vm541_vm8 = vcmp.eq.f32.partialorder %v1985_v3, inf }
 0x184   : > { %v573_v7 = vmul.f32 0.5, %v572_v30  ;;  %v556_v35 = vand.u32 2147483648, %v1841_v17  ;;  %v544_v1 = vand.u32 2147483648, %v1985_v3  ;;  %v592_v24 = vand.u32 2147483648, %v1854_v45 }
 0x185   : > { %v552_v6 = vmul.f32 %v551_v60, %v1841_v17  ;;  %v540_v10 = vmul.f32 %v539_v43, %v1985_v3  ;;  %v2430_v8 = vmov 0 }
 0x186   : > { %v574_v38 = vsub.f32 1.5, %v573_v7 }
 0x187   : > { %v643_v36 = vpop.permute.xlu1 %642  ;;  %v2044_v42 = vpop.permute.xlu2 %695  ;;  %866 = vperm.xlu2 %1406, %v828_v18   ;;  %v508_v18 = vand.u32 2147483648, %v1963_v11  ;;  %v554_v32 = vsel %vm553_vm5, %v1841_v17, %v552_v6  ;;  %v542_v23 = vsel %vm541_vm8, %v1985_v3, %v540_v10 }
 0x188   : > { %vm658_vm2 = vcmp.eq.s32.totalorder %v1923_v5, %v643_v36  ;;  %863 = vperm.xlu1 %1405, %v827_v22   ;;  %v2050_v41 = vpop.permute.xlu0 %755  ;;  %v521_v22 = vsel %vm519_vm12, %v520_v21, %v518_v53  ;;  %v586_v36 = vsub.f32 1.5, %v585_v31  ;;  %v575_v34 = vmul.f32 %v2054_v27, %v574_v38 }
 0x189   : > { %vm2058_vm3 = vmor %vm658_vm2, %vm723_vm1  ;;  %v509_v50 = vsel %vm507_vm13, %v508_v18, %v506_v20  ;;  %v557_v48 = vsel %vm555_vm9, %v556_v35, %v554_v32  ;;  %vm589_vm12 = vcmp.eq.f32.partialorder %v1854_v45, inf  ;;  %v2432_v53 = vmov 0 }
 0x18a   : > { %v587_v47 = vmul.f32 %v2047_v14, %v586_v36  ;;  %v576_v56 = vmul.f32 %v575_v34, %v2011_v37 }
 0x18c   : > { %v588_v29 = vmul.f32 %v587_v47, %v1854_v45 }
 0x18f   : > { %v2076_v12 = vpop.permute.xlu2 %704  ;;  %951 = vrot.lane.b32.xlu2 %v485_v46, %s1535_s24  ;;  %v580_v46 = vand.u32 2147483648, %v2011_v37 }
 0x190   : > { %v2081_v54 = vpop.permute.xlu1 %677  ;;  %949 = vrot.lane.b32.xlu1 %v473_v55, %s1535_s24  ;;  %v2084_v15 = vpop.permute.xlu0 %770 }
 0x197   : > { %957 = vrot.lane.b32.xlu2 %v521_v22, %s1535_s24 }
 0x198   : > { %v684_v9 = vpop.permute.xlu1 %683  ;;  %955 = vrot.lane.b32.xlu1 %v509_v50, %s1535_s24  ;;  %v753_v16 = vpop.permute.xlu2 %752 }
 0x199   : > { %vm715_vm1 = vcmp.eq.s32.totalorder %v1923_v5, %v684_v9  ;;  %vm790_vm2 = vcmp.eq.s32.totalorder %v1923_v5, %v753_v16  ;;  %v2106_v49 = vpop.permute.xlu0 %779 }
 0x19a   : > { %vm2108_vm4 = vmor %vm650_vm14, %vm715_vm1  ;;  %vm577_vm14 = vcmp.eq.f32.partialorder %v2011_v37, inf  ;;  %vm591_vm1 = vcmp.eq.f32.partialorder %v1854_v45, 0.0 }
 0x19b   : > { %vm2115_vm6 = vmor %vm1943_vm10, %vm790_vm2  ;;  %vm543_vm10 = vcmp.eq.f32.partialorder %v1985_v3, 0.0  ;;  %v590_v3 = vsel %vm589_vm12, %v1854_v45, %v588_v29  ;;  %v578_v26 = vsel %vm577_vm14, %v2011_v37, %v576_v56  ;;  %vm579_vm2 = vcmp.eq.f32.partialorder %v2011_v37, 0.0 }
 0x19c   : > { %v545_v40 = vsel %vm543_vm10, %v544_v1, %v542_v23  ;;  %v593_v55 = vsel %vm591_vm1, %v592_v24, %v590_v3  ;;  %v581_v19 = vsel %vm579_vm2, %v580_v46, %v578_v26  ;;  %vm649_vm10 = vcmp.eq.s32.totalorder %v1923_v5, %v1870_v51 }
 0x19d   : > { %vm2412_vm2 = vcmask 498688   ;;  %v1536_v51 = vmov 0.0  }
 0x19f   : > { %963 = vrot.lane.b32.xlu2 %v557_v48, %s1535_s24 }
 0x1a0   : > { %v2130_v44 = vpop.permute.xlu1 %692  ;;  %961 = vrot.lane.b32.xlu1 %v545_v40, %s1535_s24  ;;  %v762_v14 = vpop.permute.xlu2 %761 }
 0x1a1   : > { %vm793_vm11 = vcmp.eq.s32.totalorder %v1923_v5, %v762_v14  ;;  %v2135_v27 = vpop.permute.xlu0 %788 }
 0x1a2   : > { %vm2140_vm13 = vmor %vm2108_vm4, %vm793_vm11 }
 0x1a7   : > { %969 = vrot.lane.b32.xlu2 %v593_v55, %s1535_s24 }
 0x1a8   : > { %v2152_v39 = vpop.permute.xlu1 %701  ;;  %967 = vrot.lane.b32.xlu1 %v581_v19, %s1535_s24  ;;  %v768_v58 = vpop.permute.xlu2 %767 }
 0x1a9   : > { %vm795_vm4 = vcmp.eq.s32.totalorder %v1923_v5, %v768_v58  ;;  %v837_v57 = vpop.permute.xlu0 %836 }
 0x1aa   : > { %vm2158_vm5 = vmor %vm1997_vm7, %vm795_vm4  ;;  %vm714_vm7 = vcmp.eq.s32.totalorder %v1923_v5, %v1987_v63  ;;  %vm870_vm1 = vcmp.eq.s32.totalorder %v1923_v5, %v837_v57 }
 0x1ab   : > { %v2431_v8 = vsel %vm2158_vm5, 4294967295, %v2430_v8  ;;  %vm727_vm11 = vmor %vm649_vm10, %vm714_vm7  ;;  %vm713_vm10 = vcmp.eq.s32.totalorder %v1923_v5, %v2081_v54  ;;  %vm791_vm7 = vcmp.eq.s32.totalorder %v1923_v5, %v2050_v41  ;;  %vm2438_vm5 = vcmask 498688  }
 0x1b0   : > { %v2162_v45 = vpop.permute.xlu1 %710  ;;  %v777_v37 = vpop.permute.xlu2 %776 }
 0x1b1   : > { %vm798_vm8 = vcmp.eq.s32.totalorder %v1923_v5, %v777_v37  ;;  %v852_v30 = vpop.permute.xlu0 %851 }
 0x1b2   : > { %vm2167_vm9 = vmor %vm2025_vm15, %vm798_vm8 }
 0x1b3   : > { %v2433_v53 = vsel %vm2167_vm9, 4294967295, %v2432_v53 }
 0x1b8   : > { %v786_v52 = vpop.permute.xlu2 %785 }
 0x1b9   : > { %v759_v60 = vpop.permute.xlu1 %758  ;;  %vm801_vm12 = vcmp.eq.s32.totalorder %v1923_v5, %v786_v52  ;;  %v861_v31 = vpop.permute.xlu0 %860 }
 0x1ba   : > { %vm792_vm14 = vcmp.eq.s32.totalorder %v1923_v5, %v759_v60  ;;  %vm2180_vm15 = vmor %vm2058_vm3, %vm801_vm12  ;;  %vm648_vm3 = vcmp.eq.s32.totalorder %v1923_v5, %v1868_v59 }
 0x1bb   : > { %v2435_v28 = vsel %vm2180_vm15, 4294967295, %v2434_v28  ;;  %vm805_vm4 = vmor %vm727_vm11, %vm792_vm14 }
 0x1bc   : > { %vm883_vm8 = vmor %vm805_vm4, %vm870_vm1  ;;  %vm654_vm4 = vcmp.eq.s32.totalorder %v1923_v5, %v1892_v2 }
 0x1bd   : > { %v1273_v63 = vsel %vm883_vm8, 1.0, %v1536_v51  ;;  %vm726_vm11 = vmor %vm648_vm3, %vm713_vm10  ;;  %vm719_vm8 = vcmp.eq.s32.totalorder %v1923_v5, %v2044_v42 }
 0x1be   : > { %923 = vst.msk [vmem:[%s2188_s27 + $0x10] sm:$0xff] %vm2412_vm2, %v1273_v63  ;;  %vm804_vm14 = vmor %vm726_vm11, %vm791_vm7 }
 0x1bf   : > { %vm732_vm3 = vmor %vm654_vm4, %vm719_vm8  ;;  %vm722_vm8 = vcmp.eq.s32.totalorder %v1923_v5, %v2076_v12 }
 0x1c1   : > { %v765_v61 = vpop.permute.xlu1 %764  ;;  %v834_v20 = vpop.permute.xlu2 %833 }
 0x1c2   : > { %vm869_vm12 = vcmp.eq.s32.totalorder %v1923_v5, %v834_v20  ;;  %v2197_v54 = vpop.permute.xlu0 %947  ;;  %vm794_vm10 = vcmp.eq.s32.totalorder %v1923_v5, %v765_v61 }
 0x1c3   : > { %vm882_vm1 = vmor %vm804_vm14, %vm869_vm12  ;;  %vm875_vm14 = vcmp.eq.s32.totalorder %v1923_v5, %v852_v30 }
 0x1c4   : > { %v1272_v21 = vsel %vm882_vm1, 1.0, %v1536_v51  ;;  %vm807_vm7 = vmor %vm2030_vm0, %vm794_vm10  ;;  %vm653_vm0 = vcmp.eq.s32.totalorder %v1923_v5, %v1909_v0  ;;  %vm2436_vm10 = vcmask 498688  }
 0x1c5   : > { %922 = vst.msk [vmem:[%s2188_s27 + $0x8] sm:$0xff] %vm2412_vm2, %v1272_v21  ;;  %vm718_vm2 = vcmp.eq.s32.totalorder %v1923_v5, %v2130_v44  ;;  %vm2437_vm9 = vmmov %vm2436_vm10 }
 0x1c9   : > { %v774_v59 = vpop.permute.xlu1 %773  ;;  %v843_v41 = vpop.permute.xlu2 %842 }
 0x1ca   : > { %vm797_vm11 = vcmp.eq.s32.totalorder %v1923_v5, %v774_v59  ;;  %vm872_vm12 = vcmp.eq.s32.totalorder %v1923_v5, %v843_v41  ;;  %v2211_v2 = vpop.permute.xlu0 %953 }
 0x1cb   : > { %vm810_vm1 = vmor %vm732_vm3, %vm797_vm11  ;;  %vm796_vm3 = vcmp.eq.s32.totalorder %v1923_v5, %v2084_v15 }
 0x1cc   : > { %vm888_vm15 = vmor %vm810_vm1, %vm875_vm14 }
 0x1cd   : > { %v1278_v42 = vsel %vm888_vm15, 1.0, %v1536_v51  ;;  %vm885_vm4 = vmor %vm807_vm7, %vm872_vm12  ;;  %vm657_vm15 = vcmp.eq.s32.totalorder %v1923_v5, %v1911_v13 }
 0x1ce   : > { %928 = vst.msk [vmem:[%s2188_s27 + $0x38] sm:$0xff] %vm2436_vm10, %v1278_v42  ;;  %v1275_v62 = vsel %vm885_vm4, 1.0, %v1536_v51  ;;  %vm731_vm11 = vmor %vm653_vm0, %vm718_vm2  ;;  %vm878_vm4 = vcmp.eq.s32.totalorder %v1923_v5, %v861_v31 }
 0x1cf   : > { %925 = vst.msk [vmem:[%s2188_s27 + $0x20] sm:$0xff] %vm2437_vm9, %v1275_v62  ;;  %vm735_vm7 = vmor %vm657_vm15, %vm722_vm8  ;;  %vm721_vm9 = vcmp.eq.s32.totalorder %v1923_v5, %v2152_v39  ;;  %vm986_vm8 = vcmask 499168   ;;  %vm656_vm15 = vcmp.eq.s32.totalorder %v1923_v5, %v1930_v25 }
 0x1d0   : > { %vm809_vm14 = vmor %vm731_vm11, %vm796_vm3  ;;  %vm799_vm3 = vcmp.eq.s32.totalorder %v1923_v5, %v2106_v49 }
 0x1d1   : > { %v783_v43 = vpop.permute.xlu1 %782  ;;  %v849_v0 = vpop.permute.xlu2 %848  ;;  %vm734_vm11 = vmor %vm656_vm15, %vm721_vm9  ;;  %vm802_vm15 = vcmp.eq.s32.totalorder %v1923_v5, %v2135_v27 }
 0x1d2   : > { %vm800_vm12 = vcmp.eq.s32.totalorder %v1923_v5, %v783_v43  ;;  %vm874_vm1 = vcmp.eq.s32.totalorder %v1923_v5, %v849_v0  ;;  %v960_v12 = vpop.permute.xlu0 %959 }
 0x1d3   : > { %vm813_vm10 = vmor %vm735_vm7, %vm800_vm12 }
 0x1d4   : > { %vm891_vm2 = vmor %vm813_vm10, %vm878_vm4  ;;  %vm724_vm4 = vcmp.eq.s32.totalorder %v1923_v5, %v2162_v45 }
 0x1d5   : > { %v1281_v13 = vsel %vm891_vm2, 1.0, %v1536_v51  ;;  %vm887_vm0 = vmor %vm809_vm14, %vm874_vm1  ;;  %vm659_vm2 = vcmp.eq.s32.totalorder %v1923_v5, %v1957_v4 }
 0x1d6   : > { %931 = vst.msk [vmem:[%s2188_s27 + $0x50] sm:$0xff] %vm2438_vm5, %v1281_v13  ;;  %v1277_v15 = vsel %vm887_vm0, 1.0, %v1536_v51  ;;  %vm2439_vm7 = vmmov %vm2438_vm5 }
 0x1d7   : > { %927 = vst.msk [vmem:[%s2188_s27 + $0x30] sm:$0xff] %vm2439_vm7, %v1277_v15  ;;  %vm812_vm12 = vmor %vm734_vm11, %vm799_vm3 }
 0x1d8   : > { %993 = vst.msk [vmem:[%s2188_s27 + $0x30] sm:$0xff] %vm986_vm8, %v960_v12  ;;  %vm2440_vm9 = vmmov %vm2439_vm7 }
 0x1d9   : > { %v858_v7 = vpop.permute.xlu2 %857  ;;  %vm2441_vm0 = vmmov %vm2439_vm7 }
 0x1da   : > { %v831_v18 = vpop.permute.xlu1 %830  ;;  %vm877_vm14 = vcmp.eq.s32.totalorder %v1923_v5, %v858_v7  ;;  %v966_v50 = vpop.permute.xlu0 %965  ;;  %vm737_vm3 = vmor %vm659_vm2, %vm724_vm4  ;;  %vm2444_vm4 = vnez %v2431_v8 }
 0x1db   : > { %vm868_vm5 = vcmp.eq.s32.totalorder %v1923_v5, %v831_v18  ;;  %vm890_vm1 = vmor %vm812_vm12, %vm877_vm14 }
 0x1dc   : > { %vm881_vm10 = vmor %vm2115_vm6, %vm868_vm5  ;;  %v1280_v25 = vsel %vm890_vm1, 1.0, %v1536_v51 }
 0x1dd   : > { %v1271_v22 = vsel %vm881_vm10, 1.0, %v1536_v51  ;;  %930 = vst.msk [vmem:[%s2188_s27 + $0x48] sm:$0xff] %vm2440_vm9, %v1280_v25  ;;  %vm815_vm6 = vmor %vm737_vm3, %vm802_vm15 }
 0x1de   : > { %921 = vst.msk [vmem:[%s2188_s27] sm:$0xff] %vm2441_vm0, %v1271_v22  ;;  %vm2442_vm5 = vmmov %vm2441_vm0 }
 0x1df   : > { %987 = vst.msk [vmem:[%s2188_s27] sm:$0xff] %vm986_vm8, %v2197_v54  ;;  %vm2443_vm1 = vmmov %vm2441_vm0 }
 0x1e0   : > { %996 = vst.msk [vmem:[%s2188_s27 + $0x48] sm:$0xff] %vm986_vm8, %v966_v50  ;;  %vm2445_vm9 = vmmov %vm2441_vm0  ;;  %vm2446_vm0 = vnez %v2433_v53 }
 0x1e1   : > { %v867_v6 = vpop.permute.xlu2 %866  ;;  %vm2447_vm3 = vmmov %vm2443_vm1 }
 0x1e2   : > { %v840_v36 = vpop.permute.xlu1 %839  ;;  %vm880_vm11 = vcmp.eq.s32.totalorder %v1923_v5, %v867_v6  ;;  %v972_v16 = vpop.permute.xlu0 %971 }
 0x1e3   : > { %vm871_vm7 = vcmp.eq.s32.totalorder %v1923_v5, %v840_v36  ;;  %vm893_vm12 = vmor %vm815_vm6, %vm880_vm11  ;;  %vm2448_vm11 = vnez %v2435_v28 }
 0x1e4   : > { %vm884_vm14 = vmor %vm2140_vm13, %vm871_vm7  ;;  %v1283_v4 = vsel %vm893_vm12, 1.0, %v1536_v51 }
 0x1e5   : > { %v1274_v9 = vsel %vm884_vm14, 1.0, %v1536_v51  ;;  %933 = vst.msk [vmem:[%s2188_s27 + $0x60] sm:$0xff] %vm2442_vm5, %v1283_v4  ;;  %vm2449_vm12 = vmmov %vm2443_vm1 }
 0x1e6   : > { %924 = vst.msk [vmem:[%s2188_s27 + $0x18] sm:$0xff] %vm2443_vm1, %v1274_v9 }
 0x1e7   : > { %990 = vst.msk [vmem:[%s2188_s27 + $0x18] sm:$0xff] %vm986_vm8, %v2211_v2 }
 0x1e8   : > { %999 = vst.msk [vmem:[%s2188_s27 + $0x60] sm:$0xff] %vm986_vm8, %v972_v16 }
 0x1e9   : > { %v952_v10 = vpop.permute.xlu2 %951 }
 0x1ea   : > { %v846_v38 = vpop.permute.xlu1 %845  ;;  %989 = vst.msk [vmem:[%s2188_s27 + $0x10] sm:$0xff] %vm986_vm8, %v952_v10 }
 0x1eb   : > { %vm873_vm13 = vcmp.eq.s32.totalorder %v1923_v5, %v846_v38 }
 0x1ec   : > { %vm886_vm10 = vmor %vm2444_vm4, %vm873_vm13 }
 0x1ed   : > { %v1276_v49 = vsel %vm886_vm10, 1.0, %v1536_v51 }
 0x1ee   : > { %926 = vst.msk [vmem:[%s2188_s27 + $0x28] sm:$0xff] %vm2445_vm9, %v1276_v49 }
 0x1f1   : > { %v958_v11 = vpop.permute.xlu2 %957 }
 0x1f2   : > { %v855_v33 = vpop.permute.xlu1 %854  ;;  %992 = vst.msk [vmem:[%s2188_s27 + $0x28] sm:$0xff] %vm986_vm8, %v958_v11 }
 0x1f3   : > { %vm876_vm2 = vcmp.eq.s32.totalorder %v1923_v5, %v855_v33 }
 0x1f4   : > { %vm889_vm15 = vmor %vm2446_vm0, %vm876_vm2 }
 0x1f5   : > { %v1279_v32 = vsel %vm889_vm15, 1.0, %v1536_v51 }
 0x1f6   : > { %929 = vst.msk [vmem:[%s2188_s27 + $0x40] sm:$0xff] %vm2447_vm3, %v1279_v32 }
 0x1f9   : > { %v964_v47 = vpop.permute.xlu2 %963 }
 0x1fa   : > { %v864_v23 = vpop.permute.xlu1 %863  ;;  %995 = vst.msk [vmem:[%s2188_s27 + $0x40] sm:$0xff] %vm986_vm8, %v964_v47 }
 0x1fb   : > { %vm879_vm6 = vcmp.eq.s32.totalorder %v1923_v5, %v864_v23 }
 0x1fc   : > { %vm892_vm7 = vmor %vm2448_vm11, %vm879_vm6 }
 0x1fd   : > { %v1282_v35 = vsel %vm892_vm7, 1.0, %v1536_v51 }
 0x1fe   : > { %932 = vst.msk [vmem:[%s2188_s27 + $0x58] sm:$0xff] %vm2449_vm12, %v1282_v35 }
 0x201   : > { %v970_v34 = vpop.permute.xlu2 %969 }
 0x202   : > { %v950_v1 = vpop.permute.xlu1 %949  ;;  %998 = vst.msk [vmem:[%s2188_s27 + $0x58] sm:$0xff] %vm986_vm8, %v970_v34 }
 0x203   : > { %988 = vst.msk [vmem:[%s2188_s27 + $0x8] sm:$0xff] %vm986_vm8, %v950_v1 }
 0x20a   : > { %v956_v48 = vpop.permute.xlu1 %955 }
 0x20b   : > { %991 = vst.msk [vmem:[%s2188_s27 + $0x20] sm:$0xff] %vm986_vm8, %v956_v48 }
 0x212   : > { %v962_v40 = vpop.permute.xlu1 %961 }
 0x213   : > { %994 = vst.msk [vmem:[%s2188_s27 + $0x38] sm:$0xff] %vm986_vm8, %v962_v40 }
 0x217   : > { %1006 = sbr.rel (!%p1572_p4) target bundleno = 600 (0x258), region = 28 }
 0x21a   : > { %v968_v5 = vpop.permute.xlu1 %967 }
 0x21b   : > { %997 = vst.msk [vmem:[%s2188_s27 + $0x50] sm:$0xff] %vm986_vm8, %v968_v5 }
 0x21c   : > { %s2459_s28 = smov (!%p1009_p8, %s1008_s28), 13 }
 0x21d   : > { %s1284_s4 = sshll.u32 %s2459_s28, 3 }
 0x21e   : > { %p1287_p9 = scmp.eq.s32.totalorder %s1284_s4, 0 }
 0x21f   : > { %1434 = sdivrem.u32 (!%p1287_p9), %s2459_s28, 13 }
 0x220   : > { %1017 = sbr.rel (%p1287_p9) target bundleno = 600 (0x258), region = 32 }
 0x228   : > { %s2330_s5 = spop.drf %1434 }
 0x229   : > { %s1436_s6 = spop.drf %1434  ;;  %p1288_p10 = scmp.le.s32.totalorder %s2330_s5, 0 }
 0x22a   : > { %s2450_s8 = smov (!%p1288_p10), %s2324_s3  ;;  %s2451_s9 = smov (!%p1288_p10), %s2188_s27 }
 0x22b   : > { %1222 = sbr.rel (%p1288_p10) target bundleno = 574 (0x23e), region = 108  ;;  %s2339_s11 = smov (!%p1288_p10), 0  }
 0x22c   : > { %s2341_s12 = smov (!%p1288_p10), 0  }
 0x230 LB: >> { %v1106_v29 = vld [vmem:[%s1502_s9] sm:$0xff]  ;;  %v1108_v44 = vld [vmem:[%s1502_s9 + $0x8] sm:$0xff]  ;;  %v1110_v14 = vld [vmem:[%s1502_s9 + $0x10] sm:$0xff]  ;;  %s1132_s14 = sadd.s32 1, %s1506_s11  ;;  %s1100_s12 = sadd.s32 1, %s1510_s12   ;;  %s1510_s12 = sphi %s2341_s12, %s1100_s12   ;;  %s1506_s11 = sphi %s2339_s11, %s2454_s11   ;;  %s1502_s9 = sphi %s2451_s9, %s2453_s9   ;;  %s1498_s8 = sphi %s2450_s8, %s2452_s8  }
 0x231   : >> { %1107 = vst [vmem:[%s1498_s8] sm:$0xff] %v1106_v29  ;;  %v1112_v56 = vld [vmem:[%s1502_s9 + $0x18] sm:$0xff]  ;;  %p1133_p11 = scmp.ge.s32.totalorder %s1132_s14, %s2330_s5  ;;  %v1114_v27 = vld [vmem:[%s1502_s9 + $0x20] sm:$0xff]  ;;  %v1116_v17 = vld [vmem:[%s1502_s9 + $0x28] sm:$0xff]  ;;  %p1099_p12 = scmp.ge.s32.totalorder %s1100_s12, %s2330_s5 }
 0x232   : >> { %1109 = vst [vmem:[%s1498_s8 + $0x8] sm:$0xff] %v1108_v44  ;;  %v1118_v3 = vld [vmem:[%s1502_s9 + $0x30] sm:$0xff]  ;;  %v1120_v26 = vld [vmem:[%s1502_s9 + $0x38] sm:$0xff]  ;;  %v1122_v24 = vld [vmem:[%s1502_s9 + $0x40] sm:$0xff] }
 0x233   : >> { %1111 = vst [vmem:[%s1498_s8 + $0x10] sm:$0xff] %v1110_v14  ;;  %s2461_s14 = smov (%p1133_p11, %s1132_s14), 0  ;;  %v1124_v46 = vld [vmem:[%s1502_s9 + $0x48] sm:$0xff]  ;;  %v1126_v55 = vld [vmem:[%s1502_s9 + $0x50] sm:$0xff]  ;;  %v1128_v19 = vld [vmem:[%s1502_s9 + $0x58] sm:$0xff] }
 0x234   : >> { %1113 = vst [vmem:[%s1498_s8 + $0x18] sm:$0xff] %v1112_v56  ;;  %s1135_s15 = smul.u32 104, %s2461_s14  ;;  %v1130_v39 = vld [vmem:[%s1502_s9 + $0x60] sm:$0xff]  ;;  %s2454_s11 = smov %s2461_s14 }
 0x235   : >> { %1115 = vst [vmem:[%s1498_s8 + $0x20] sm:$0xff] %v1114_v27 }
 0x236   : >> { %1117 = vst [vmem:[%s1498_s8 + $0x28] sm:$0xff] %v1116_v17  ;;  %s1137_s16 = scalar_lea.vmem %s2188_s27, %s1135_s15 [#allocation2]   ;;  %s1138_s17 = scalar_lea.vmem %s2324_s3, %s1135_s15  }
 0x237   : >> { %1119 = vst [vmem:[%s1498_s8 + $0x30] sm:$0xff] %v1118_v3  ;;  %s2453_s9 = smov %s1137_s16 }
 0x238   : >> { %1121 = vst [vmem:[%s1498_s8 + $0x38] sm:$0xff] %v1120_v26 }
 0x239   : >> { %1123 = vst [vmem:[%s1498_s8 + $0x40] sm:$0xff] %v1122_v24  ;;  %1102 = sbr.rel (!%p1099_p12) target bundleno = 560 (0x230), region = 114 }
 0x23a   : >> { %1125 = vst [vmem:[%s1498_s8 + $0x48] sm:$0xff] %v1124_v46 }
 0x23b   : >> { %1127 = vst [vmem:[%s1498_s8 + $0x50] sm:$0xff] %v1126_v55 }
 0x23c   : >> { %1129 = vst [vmem:[%s1498_s8 + $0x58] sm:$0xff] %v1128_v19 }
 0x23d   : >> { %1131 = vst [vmem:[%s1498_s8 + $0x60] sm:$0xff] %v1130_v39  ;;  %s2452_s8 = smov %s1138_s17 }
 0x23e PF: > { %1437 = sdivrem.u32 %s2459_s28, 13 }
 0x23f   : > { %s1289_s18 = smul.u32 104, %s2330_s5 }
 0x241   : > { %s2395_s19 = scalar_lea.vmem %s2188_s27, %s1289_s18 [#allocation2]   ;;  %s1145_s20 = scalar_lea.vmem %s2324_s3, %s1289_s18  }
 0x247   : > { %s1438_s21 = spop.drf %1437 }
 0x248   : > { %s1439_s22 = spop.drf %1437 }
 0x249   : > { %p1291_p13 = scmp.le.s32.totalorder %s1439_s22, 0 }
 0x24a   : > { %s1512_s23 = smov (!%p1291_p13), %s1145_s20   ;;  %s1516_s24 = smov (!%p1291_p13), %s2395_s19  }
 0x24b   : > { %1236 = sbr.rel (%p1291_p13) target bundleno = 600 (0x258), region = 119  ;;  %s1520_s25 = smov (!%p1291_p13), 0  }
 0x24c   : > { %s1524_s26 = smov (!%p1291_p13), 0  }
 0x250 LB: >> { %v1155_v58 = vld [vmem:[%s1518_s24] sm:$0xff]  ;;  %s1157_s27 = sadd.s32 1, %s1522_s25  ;;  %s1149_s26 = sadd.s32 1, %s1526_s26   ;;  %s1526_s26 = sphi %s1524_s26, %s1149_s26   ;;  %s1522_s25 = sphi %s1520_s25, %s1521_s25   ;;  %s1518_s24 = sphi %s1516_s24, %s1162_s24   ;;  %s1514_s23 = sphi %s1512_s23, %s1163_s23  }
 0x251   : >> { %1156 = vst [vmem:[%s1514_s23] sm:$0xff] %v1155_v58  ;;  %p1158_p0 = scmp.ge.s32.totalorder %s1157_s27, %s1439_s22  ;;  %p1148_p1 = scmp.ge.s32.totalorder %s1149_s26, %s1439_s22 }
 0x253   : >> { %s2463_s27 = smov (%p1158_p0, %s1157_s27), 0  ;;  %1151 = sbr.rel (!%p1148_p1) target bundleno = 592 (0x250), region = 125 }
 0x254   : >> { %s1292_s28 = sshll.u32 %s2463_s27, 3  ;;  %s1521_s25 = smov %s2463_s27  }
 0x255   : >> { %s1162_s24 = scalar_lea.vmem %s2395_s19, %s1292_s28 [#allocation2]   ;;  %s1163_s23 = scalar_lea.vmem %s1145_s20, %s1292_s28  }
 0x258 PF: > { %p8_p2 = scmp.ge.s32.totalorder %s1562_s10, 4   ;;  %s2455_s6 = smov %s1490_s7 }
 0x259   : > { %s2456_s7 = smov %s1570_s13  ;;  %s2457_s8 = smov %s1562_s10 }
 0x25a   :  { %10 = sbr.rel (!%p8_p2) target bundleno = 2 (0x2), region = 136 }

</bundles_post_ra>
